<compile_context>
chip_gen: v7x
topology: tpu7x:2x2x1
jax: 0.10.0
libtpu: 0.0.40
codegen_flags: <defaults>
</compile_context>

<pallas_src>
import jax
import jax.numpy as jnp
from jax.experimental import pallas as pl
from jax.experimental.pallas import tpu as pltpu


def _lora_proj_kernel(x_ref, w_ref, b_ref, wd_ref, wu_ref, o_ref, acc_ref, down_ref):
    """One (tm, tn) output tile; grid = (M tiles, N tiles, K tiles)."""
    j = pl.program_id(1)
    k = pl.program_id(2)
    nk = pl.num_programs(2)

    x = x_ref[...]                                                   # (tm, tk)

    # ---- base linear: accumulate x @ W^T over K tiles (f32 on the MXU) ----
    @pl.when(k == 0)
    def _():
        acc_ref[...] = jnp.zeros_like(acc_ref)

    acc_ref[...] += jnp.dot(x, w_ref[...], preferred_element_type=jnp.float32)

    # ---- LoRA down projection: only once per M tile (j == 0), summed over K ----
    @pl.when((j == 0) & (k == 0))
    def _():
        down_ref[...] = jnp.zeros_like(down_ref)

    @pl.when(j == 0)
    def _():
        down_ref[...] += jnp.dot(x, wd_ref[...],
                                 preferred_element_type=jnp.float32)  # (tm, Rp)

    # ---- epilogue on the last K tile: up-projection (scale folded) + bias ----
    @pl.when(k == nk - 1)
    def _():
        acc = acc_ref[...] + jnp.dot(down_ref[...].astype(wu_ref.dtype), wu_ref[...],
                                     preferred_element_type=jnp.float32)
        acc = acc + b_ref[...].astype(jnp.float32)   # bias last (keeps MXU adds adjacent)
        o_ref[...] = acc.astype(o_ref.dtype)


def _round_up(x, m):
    return ((x + m - 1) // m) * m


def prepare_lora_weights(w, b, w_down, w_up, *, lora_scale=1.0,
                         network_alpha=None, rank=None, compute_dtype=None):
    """One-time weight prep (transpose, scale fold, rank/N zero-padding).

    w:      (out, in)   regular nn.Linear weight
    b:      (out,)      regular nn.Linear bias
    w_down: (rank, in)  LoRA down weight
    w_up:   (out, rank) LoRA up weight
    Returns (w_t, b2, wd_t, wu_t, n_out) ready for patched_lora_projection.
    """
    w = jnp.asarray(w)
    if compute_dtype is None:
        compute_dtype = w.dtype
    if rank is None:
        rank = w_down.shape[0]
    alpha_factor = 1.0 if network_alpha is None else float(network_alpha) / float(rank)
    lora_factor = float(lora_scale) * alpha_factor

    n_out, _ = w.shape
    n_pad = _round_up(n_out, 128)
    r_pad = _round_up(rank, 128)

    w_t = jnp.asarray(w, compute_dtype).T                                   # (K, N)
    wd_t = jnp.asarray(w_down, compute_dtype).T                             # (K, rank)
    # fold lora_scale * alpha/rank into the up weight (free, one-time)
    wu_t = (jnp.asarray(w_up, jnp.float32).T * lora_factor).astype(compute_dtype)  # (rank, N)
    b2 = jnp.asarray(b, jnp.float32).reshape(1, -1)                         # (1, N) f32

    # lane-dense padding: N -> multiple of 128, rank -> 128 lanes (zeros are inert)
    if n_pad != n_out:
        w_t = jnp.pad(w_t, ((0, 0), (0, n_pad - n_out)))
        wu_t = jnp.pad(wu_t, ((0, 0), (0, n_pad - n_out)))
        b2 = jnp.pad(b2, ((0, 0), (0, n_pad - n_out)))
    if r_pad != rank:
        wd_t = jnp.pad(wd_t, ((0, 0), (0, r_pad - rank)))
        wu_t = jnp.pad(wu_t, ((0, r_pad - rank), (0, 0)))

    return w_t, b2, wd_t, wu_t, n_out


def _pick_n_tile(n_pad, tn):
    """Lane-dense N tile that divides the (already 128-padded) N."""
    if n_pad <= tn:
        return n_pad
    for cand in (tn, 512, 256, 128):
        if cand <= n_pad and n_pad % cand == 0:
            return cand
    return n_pad


def _pick_k_tile(K, tk_max):
    """K tile: full K when small, else a 128-multiple divisor of K."""
    if K <= tk_max:
        return K
    for cand in (1024, 512, 256, 128):
        if cand <= tk_max and K % cand == 0:
            return cand
    # TODO(synk): K with no 128-multiple divisor falls back to a single full-K tile.
    return K


def _vmem_capacity_bytes():
    try:
        return int(pltpu.get_tpu_info().vmem_capacity_bytes)
    except Exception:
        return 64 * 1024 * 1024  # conservative (v7x-sized) fallback


def patched_lora_projection(x, prepared, *, tm=None, tn=256, tk_max=1024):
    """x: (..., in_features).  prepared: output of prepare_lora_weights."""
    w_t, b2, wd_t, wu_t, n_out = prepared
    compute_dtype = w_t.dtype
    orig_shape = x.shape
    out_dtype = x.dtype
    K = orig_shape[-1]
    Np = w_t.shape[1]      # padded N (multiple of 128)
    Rp = wd_t.shape[1]     # padded rank (128)

    # explicit cast to the compute dtype (bf16 path friendly; acc stays f32)
    x2 = x.reshape(-1, K).astype(compute_dtype)
    M = x2.shape[0]

    vmem_cap = _vmem_capacity_bytes()
    if tm is None:
        # bigger M tile on chips with 128 MiB VMEM (v5e/v6e) halves W^T re-reads
        tm = 512 if vmem_cap >= 96 * 1024 * 1024 else 256

    itemsize = jnp.dtype(compute_dtype).itemsize
    sublane = 8 * max(1, 4 // itemsize)   # 8 for f32, 16 for bf16

    # ---- M tiling ----
    if M <= tm:
        tm_eff = max(sublane, _round_up(M, sublane))
        m_pad = tm_eff
    else:
        tm_eff = tm
        m_pad = pl.cdiv(M, tm) * tm
    if m_pad != M:
        x2 = jnp.pad(x2, ((0, m_pad - M), (0, 0)))

    # ---- N / K tiling ----
    tn_eff = _pick_n_tile(Np, tn)
    tk_eff = _pick_k_tile(K, tk_max)

    # ---- VMEM budget (Pallas double-buffers each pipelined operand) ----
    out_itemsize = jnp.dtype(out_dtype).itemsize
    tiles = 2 * (tm_eff * tk_eff * itemsize         # x tile
                 + tk_eff * tn_eff * itemsize       # W^T tile
                 + tn_eff * 4                       # bias tile (f32)
                 + tk_eff * Rp * itemsize           # down^T tile
                 + Rp * tn_eff * itemsize           # scaled up^T tile
                 + tm_eff * tn_eff * out_itemsize)  # output tile
    scratch = tm_eff * tn_eff * 4 + tm_eff * Rp * 4
    headroom = 4 * 1024 * 1024                      # compiler internal scratch
    vmem_limit = int(max(16 * 1024 * 1024,
                         min(tiles + scratch + headroom, (vmem_cap * 3) // 4)))

    grid = (m_pad // tm_eff, Np // tn_eff, K // tk_eff)

    # TODO(synk): on v5e, consider pipeline_mode=pl.Buffered(3) on the W^T spec
    # if profiling shows exposed DMA (plenty of VMEM there; do not on v7x).
    out = pl.pallas_call(
        _lora_proj_kernel,
        out_shape=jax.ShapeDtypeStruct((m_pad, Np), out_dtype),
        grid_spec=pltpu.PrefetchScalarGridSpec(
            num_scalar_prefetch=0,
            grid=grid,
            in_specs=[
                pl.BlockSpec((tm_eff, tk_eff), lambda i, j, k: (i, k)),   # x tile
                pl.BlockSpec((tk_eff, tn_eff), lambda i, j, k: (k, j)),   # W^T tile
                pl.BlockSpec((1, tn_eff), lambda i, j, k: (0, j)),        # bias tile
                pl.BlockSpec((tk_eff, Rp), lambda i, j, k: (k, 0)),       # down^T tile
                pl.BlockSpec((Rp, tn_eff), lambda i, j, k: (0, j)),       # scaled up^T tile
            ],
            out_specs=pl.BlockSpec((tm_eff, tn_eff), lambda i, j, k: (i, j)),
            scratch_shapes=[
                pltpu.VMEM((tm_eff, tn_eff), jnp.float32),   # base accumulator
                pltpu.VMEM((tm_eff, Rp), jnp.float32),       # cached down-projection
            ],
        ),
        compiler_params=pltpu.CompilerParams(
            # N axis must be "arbitrary": the down scratch computed at j==0 is
            # reused for j>0.  K is the reduction axis.
            dimension_semantics=("parallel", "arbitrary", "arbitrary"),
            vmem_limit_bytes=vmem_limit),
    )(x2, w_t, b2, wd_t, wu_t)

    if m_pad != M:
        out = out[:M]
    if Np != n_out:
        out = out[:, :n_out]
    return out.reshape(*orig_shape[:-1], n_out)


def reference(x, w, b, w_down, w_up, *, lora_scale, network_alpha, rank):
    xf = jnp.asarray(x, jnp.float32)
    base = xf @ jnp.asarray(w, jnp.float32).T + jnp.asarray(b, jnp.float32)
    lora = (xf @ jnp.asarray(w_down, jnp.float32).T) @ jnp.asarray(w_up, jnp.float32).T
    if network_alpha is not None:
        lora = lora * (network_alpha / rank)
    return base + lora_scale * lora


def _make_params(key, in_features, out_features, rank):
    k1, k2, k3, k4 = jax.random.split(key, 4)
    # regular_linear_layer params (nn.Linear(in, out)): weight (out, in), bias (out,)
    w = jax.random.normal(k1, (out_features, in_features), jnp.float32) * 0.05
    b = jax.random.normal(k2, (out_features,), jnp.float32) * 0.05
    # LoRA: down (rank, in) ~ N(0, (1/rank)^2); up (out, rank).  The module
    # zero-inits `up`; use random values so the LoRA path is exercised.
    w_down = jax.random.normal(k3, (rank, in_features), jnp.float32) * (1.0 / rank)
    w_up = jax.random.normal(k4, (out_features, rank), jnp.float32) * 0.1
    return w, b, w_down, w_up


if __name__ == "__main__":
    key = jax.random.PRNGKey(0)
    kx1, kp1, kx2, kp2 = jax.random.split(key, 4)

    # ---------- test 1: small shapes, f32 compute (tight tolerance) ----------
    batch, seq = 2, 8
    in_features, out_features, rank = 32, 64, 4
    lora_scale, network_alpha = 0.7, 8.0

    x = jax.random.normal(kx1, (batch, seq, in_features), jnp.float32)
    w, b, w_down, w_up = _make_params(kp1, in_features, out_features, rank)

    prepared = prepare_lora_weights(
        w, b, w_down, w_up,
        lora_scale=lora_scale, network_alpha=network_alpha, rank=rank)

    out = patched_lora_projection(x, prepared)
    jax.block_until_ready(out)

    ref = reference(
        x.reshape(batch * seq, in_features), w, b, w_down, w_up,
        lora_scale=lora_scale, network_alpha=network_alpha, rank=rank,
    ).reshape(batch, seq, out_features)

    assert out.shape == (batch, seq, out_features)
    assert jnp.allclose(out, ref, atol=1e-5, rtol=1e-5), "mismatch (f32, small)"

    # ---------- test 2: exercises K tiling, multiple N tiles, odd M/N ----------
    b2_, s2_, K2, N2, R2 = 5, 8, 256, 192, 8
    x_b = jax.random.normal(kx2, (b2_, s2_, K2), jnp.float32)
    w2, bb2, wd2, wu2 = _make_params(kp2, K2, N2, R2)

    prep2 = prepare_lora_weights(w2, bb2, wd2, wu2,
                                 lora_scale=1.3, network_alpha=None, rank=R2)
    out2 = patched_lora_projection(x_b, prep2, tn=128, tk_max=128)  # 2 K tiles, 2 N tiles
    jax.block_until_ready(out2)
    ref2 = reference(x_b.reshape(-1, K2), w2, bb2, wd2, wu2,
                     lora_scale=1.3, network_alpha=None, rank=R2).reshape(b2_, s2_, N2)
    assert out2.shape == (b2_, s2_, N2)
    assert jnp.allclose(out2, ref2, atol=2e-2, rtol=2e-2), "mismatch (K-tiled)"

    # ---------- test 3: bf16 compute path (loose tolerance, scale folded in bf16) ----------
    prep_bf16 = prepare_lora_weights(
        w, b, w_down, w_up,
        lora_scale=lora_scale, network_alpha=network_alpha, rank=rank,
        compute_dtype=jnp.bfloat16)
    out_bf16 = patched_lora_projection(x, prep_bf16)
    jax.block_until_ready(out_bf16)
    assert out_bf16.shape == (batch, seq, out_features)
    assert jnp.allclose(out_bf16, ref, atol=5e-2, rtol=5e-2), "mismatch (bf16)"

    print("KERNEL_OK")
</pallas_src>

<mosaic_0001>
module attributes {stable_mosaic.version = 11 : i64} {
  func.func @_lora_proj_kernel(%arg0: i32, %arg1: i32, %arg2: i32, %arg3: memref<16x32xf32, #tpu.memory_space<vmem>>, %arg4: memref<32x128xf32, #tpu.memory_space<vmem>>, %arg5: memref<1x128xf32, #tpu.memory_space<vmem>>, %arg6: memref<32x128xf32, #tpu.memory_space<vmem>>, %arg7: memref<128x128xf32, #tpu.memory_space<vmem>>, %arg8: memref<16x128xf32, #tpu.memory_space<vmem>>, %arg9: memref<16x128xf32, #tpu.memory_space<vmem>>, %arg10: memref<16x128xf32, #tpu.memory_space<vmem>>) attributes {dimension_semantics = [#tpu.dimension_semantics<parallel>, #tpu.dimension_semantics<arbitrary>, #tpu.dimension_semantics<arbitrary>], iteration_bounds = array<i64: 1, 1, 1>, scalar_prefetch = 0 : i64, scratch_operands = 2 : i64, tpu.core_type = #tpu.core_type<tc>, window_params = [{transform_indices = @transform_0, window_bounds = array<i64: 16, 32>}, {transform_indices = @transform_1, window_bounds = array<i64: 32, 128>}, {transform_indices = @transform_2, window_bounds = array<i64: 1, 128>}, {transform_indices = @transform_3, window_bounds = array<i64: 32, 128>}, {transform_indices = @transform_4, window_bounds = array<i64: 128, 128>}, {transform_indices = @transform_5, window_bounds = array<i64: 16, 128>}]} {
    %c0 = arith.constant 0 : index
    %c0_0 = arith.constant 0 : index
    %0 = vector.load %arg3[%c0, %c0_0] : memref<16x32xf32, #tpu.memory_space<vmem>>, vector<16x32xf32>
    %c0_i32 = arith.constant 0 : i32
    %1 = arith.cmpi eq, %arg2, %c0_i32 : i32
    %2 = arith.extui %1 : i1 to i32
    %c0_i32_1 = arith.constant 0 : i32
    %3 = arith.cmpi ne, %2, %c0_i32_1 : i32
    scf.if %3 {
      %cst_15 = arith.constant 0.000000e+00 : f32
      %20 = vector.broadcast %cst_15 : f32 to vector<16x128xf32>
      %c0_16 = arith.constant 0 : index
      %c0_17 = arith.constant 0 : index
      %21 = vector.load %arg9[%c0_16, %c0_17] : memref<16x128xf32, #tpu.memory_space<vmem>>, vector<16x128xf32>
      tpu.vector_store %arg9[%c0_16, %c0_17], %20 {strides = array<i32>} : memref<16x128xf32, #tpu.memory_space<vmem>>, vector<16x128xf32>,
    } else {
    }
    %c0_2 = arith.constant 0 : index
    %c0_3 = arith.constant 0 : index
    %4 = vector.load %arg9[%c0_2, %c0_3] : memref<16x128xf32, #tpu.memory_space<vmem>>, vector<16x128xf32>
    %c0_4 = arith.constant 0 : index
    %c0_5 = arith.constant 0 : index
    %5 = vector.load %arg4[%c0_4, %c0_5] : memref<32x128xf32, #tpu.memory_space<vmem>>, vector<32x128xf32>
    %cst = arith.constant dense<0.000000e+00> : vector<16x128xf32>
    %6 = tpu.matmul %0, %5, %cst {dimension_numbers = #tpu.dot_dimension_numbers<[1], [0], [0], [1], [0, 0, 1, 1], [], []>} : vector<16x32xf32>, vector<32x128xf32>, vector<16x128xf32> -> vector<16x128xf32>
    %7 = arith.addf %4, %6 : vector<16x128xf32>
    %c0_6 = arith.constant 0 : index
    %c0_7 = arith.constant 0 : index
    %8 = vector.load %arg9[%c0_6, %c0_7] : memref<16x128xf32, #tpu.memory_space<vmem>>, vector<16x128xf32>
    tpu.vector_store %arg9[%c0_6, %c0_7], %7 {strides = array<i32>} : memref<16x128xf32, #tpu.memory_space<vmem>>, vector<16x128xf32>,
    %c0_i32_8 = arith.constant 0 : i32
    %9 = arith.cmpi eq, %arg1, %c0_i32_8 : i32
    %c0_i32_9 = arith.constant 0 : i32
    %10 = arith.cmpi eq, %arg2, %c0_i32_9 : i32
    %11 = arith.andi %9, %10 : i1
    %12 = arith.extui %11 : i1 to i32
    %c0_i32_10 = arith.constant 0 : i32
    %13 = arith.cmpi ne, %12, %c0_i32_10 : i32
    scf.if %13 {
      %cst_15 = arith.constant 0.000000e+00 : f32
      %20 = vector.broadcast %cst_15 : f32 to vector<16x128xf32>
      %c0_16 = arith.constant 0 : index
      %c0_17 = arith.constant 0 : index
      %21 = vector.load %arg10[%c0_16, %c0_17] : memref<16x128xf32, #tpu.memory_space<vmem>>, vector<16x128xf32>
      tpu.vector_store %arg10[%c0_16, %c0_17], %20 {strides = array<i32>} : memref<16x128xf32, #tpu.memory_space<vmem>>, vector<16x128xf32>,
    } else {
    }
    %c0_i32_11 = arith.constant 0 : i32
    %14 = arith.cmpi eq, %arg1, %c0_i32_11 : i32
    %15 = arith.extui %14 : i1 to i32
    %c0_i32_12 = arith.constant 0 : i32
    %16 = arith.cmpi ne, %15, %c0_i32_12 : i32
    scf.if %16 {
      %c0_15 = arith.constant 0 : index
      %c0_16 = arith.constant 0 : index
      %20 = vector.load %arg10[%c0_15, %c0_16] : memref<16x128xf32, #tpu.memory_space<vmem>>, vector<16x128xf32>
      %c0_17 = arith.constant 0 : index
      %c0_18 = arith.constant 0 : index
      %21 = vector.load %arg6[%c0_17, %c0_18] : memref<32x128xf32, #tpu.memory_space<vmem>>, vector<32x128xf32>
      %cst_19 = arith.constant dense<0.000000e+00> : vector<16x128xf32>
      %22 = tpu.matmul %0, %21, %cst_19 {dimension_numbers = #tpu.dot_dimension_numbers<[1], [0], [0], [1], [0, 0, 1, 1], [], []>} : vector<16x32xf32>, vector<32x128xf32>, vector<16x128xf32> -> vector<16x128xf32>
      %23 = arith.addf %20, %22 : vector<16x128xf32>
      %c0_20 = arith.constant 0 : index
      %c0_21 = arith.constant 0 : index
      %24 = vector.load %arg10[%c0_20, %c0_21] : memref<16x128xf32, #tpu.memory_space<vmem>>, vector<16x128xf32>
      tpu.vector_store %arg10[%c0_20, %c0_21], %23 {strides = array<i32>} : memref<16x128xf32, #tpu.memory_space<vmem>>, vector<16x128xf32>,
    } else {
    }
    %c0_i32_13 = arith.constant 0 : i32
    %17 = arith.cmpi eq, %arg2, %c0_i32_13 : i32
    %18 = arith.extui %17 : i1 to i32
    %c0_i32_14 = arith.constant 0 : i32
    %19 = arith.cmpi ne, %18, %c0_i32_14 : i32
    scf.if %19 {
      %c0_15 = arith.constant 0 : index
      %c0_16 = arith.constant 0 : index
      %20 = vector.load %arg9[%c0_15, %c0_16] : memref<16x128xf32, #tpu.memory_space<vmem>>, vector<16x128xf32>
      %c0_17 = arith.constant 0 : index
      %c0_18 = arith.constant 0 : index
      %21 = vector.load %arg10[%c0_17, %c0_18] : memref<16x128xf32, #tpu.memory_space<vmem>>, vector<16x128xf32>
      %c0_19 = arith.constant 0 : index
      %c0_20 = arith.constant 0 : index
      %22 = vector.load %arg7[%c0_19, %c0_20] : memref<128x128xf32, #tpu.memory_space<vmem>>, vector<128x128xf32>
      %cst_21 = arith.constant dense<0.000000e+00> : vector<16x128xf32>
      %23 = tpu.matmul %21, %22, %cst_21 {dimension_numbers = #tpu.dot_dimension_numbers<[1], [0], [0], [1], [0, 0, 1, 1], [], []>} : vector<16x128xf32>, vector<128x128xf32>, vector<16x128xf32> -> vector<16x128xf32>
      %24 = arith.addf %20, %23 : vector<16x128xf32>
      %c0_22 = arith.constant 0 : index
      %c0_23 = arith.constant 0 : index
      %25 = vector.load %arg5[%c0_22, %c0_23] : memref<1x128xf32, #tpu.memory_space<vmem>>, vector<1x128xf32>
      %26 = vector.broadcast %25 : vector<1x128xf32> to vector<16x128xf32>
      %27 = arith.addf %24, %26 : vector<16x128xf32>
      %c0_24 = arith.constant 0 : index
      %c0_25 = arith.constant 0 : index
      %28 = vector.load %arg8[%c0_24, %c0_25] : memref<16x128xf32, #tpu.memory_space<vmem>>, vector<16x128xf32>
      tpu.vector_store %arg8[%c0_24, %c0_25], %27 {strides = array<i32>} : memref<16x128xf32, #tpu.memory_space<vmem>>, vector<16x128xf32>,
    } else {
    }
    return
  }
  func.func @transform_0(%arg0: i32, %arg1: i32, %arg2: i32) -> (i32, i32) {
    %c0_i32 = arith.constant 0 : i32
    return %arg0, %arg2 : i32, i32
  }
  func.func @transform_1(%arg0: i32, %arg1: i32, %arg2: i32) -> (i32, i32) {
    %c0_i32 = arith.constant 0 : i32
    return %arg2, %arg1 : i32, i32
  }
  func.func @transform_2(%arg0: i32, %arg1: i32, %arg2: i32) -> (i32, i32) {
    %c0_i32 = arith.constant 0 : i32
    %c0_i32_0 = arith.constant 0 : i32
    return %c0_i32, %arg1 : i32, i32
  }
  func.func @transform_3(%arg0: i32, %arg1: i32, %arg2: i32) -> (i32, i32) {
    %c0_i32 = arith.constant 0 : i32
    %c0_i32_0 = arith.constant 0 : i32
    return %arg2, %c0_i32 : i32, i32
  }
  func.func @transform_4(%arg0: i32, %arg1: i32, %arg2: i32) -> (i32, i32) {
    %c0_i32 = arith.constant 0 : i32
    %c0_i32_0 = arith.constant 0 : i32
    return %c0_i32, %arg1 : i32, i32
  }
  func.func @transform_5(%arg0: i32, %arg1: i32, %arg2: i32) -> (i32, i32) {
    %c0_i32 = arith.constant 0 : i32
    return %arg0, %arg1 : i32, i32
  }
}

</mosaic_0001>

<bundles_post_ra>
// kernel: tpu_custom_call.1
= control target key start
LH: loop header
LB: loop body
LE: loop exit
PB: predicated region body
PF: predicated region fallthrough
CT: control target
= control target key end

     0   :  { %10 = vsyncpa [#allocation5], 0  ;;  %s801_s0 = inlined_call_operand.hbm [shape: f32[16,32], index: 0, kind: input, shape index: {}]   ;;  %s802_s1 = inlined_call_operand.hbm [shape: f32[32,128], index: 1, kind: input, shape index: {}]   ;;  %s803_s2 = inlined_call_operand.vmem [shape: f32[1,128], index: 2, kind: input, shape index: {}]   ;;  %s804_s3 = inlined_call_operand.hbm [shape: f32[32,128], index: 3, kind: input, shape index: {}]   ;;  %s805_s4 = inlined_call_operand.hbm [shape: f32[128,128], index: 4, kind: input, shape index: {}]   ;;  %s806_s5 = inlined_call_operand.hbm [shape: f32[16,128], index: 5, kind: output, shape index: {}]  }
   0x1   :  { %11 = vsyncpa [#allocation8], 0 }
   0x2   :  { %12 = vsyncpa [#allocation11], 0 }
   0x3   :  { %13 = vsyncpa [#allocation6], 0  ;;  %s668_s18 = smov [#allocation7]   ;;  %s669_s20 = smov [#allocation4]  }
   0x4   :  { %s31_s19 = sshll.u32 %s668_s18, 4  ;;  %s19_s21 = sshll.u32 %s669_s20, 4  ;;  %s32_s19 = int_to_ptr.vmem [resolvable:$true] %s31_s19  ;;  %s705_s21 = int_to_ptr.vmem [resolvable:$true] %s19_s21 }
   0x5   :  { %s550_s24 = scalar_lea.hbm %s802_s1, 512 }
   0x6   :  { %p551_p0 = scmp.ne.s32.totalorder %s802_s1, %s550_s24  ;;  %p554_p1 = scmp.lt.u32.totalorder %s550_s24, %s802_s1 }
   0x8   :  { %p556_p2 = pnand %p554_p1, %p551_p0 }
   0xa   :  { %559 = shalt.err (!%p556_p2)
}
   0xb   :  { %s560_s29 = scalar_lea.vmem %s32_s19, 512  ;;  %p565_p4 = scmp.lt.s32.totalorder %s32_s19, %s32_s19 }
   0xc   :  { %p561_p3 = scmp.ne.s32.totalorder %s32_s19, %s560_s29  ;;  %p566_p5 = scmp.lt.s32.totalorder %s560_s29, %s560_s29 }
   0xe   :  { %p567_p6 = por %p566_p5, %p565_p4 }
  0x10   :  { %p568_p7 = pnand %p567_p6, %p561_p3 }
  0x12   :  { %571 = shalt.err (!%p568_p7)
}
  0x13   :  { %s670_s30 = smov 128   ;;  %s671_s6 = smov 8  }
  0x14   :  { %37 = dma.hbm_to_vmem [thread:$0]  %s802_s1, 512, %s32_s19, [#allocation8], %s670_s30, %s670_s30, %s671_s6  }
  0x15   :  { %s572_s11 = scalar_lea.hbm %s801_s0, 256 }
  0x16   :  { %p573_p8 = scmp.ne.s32.totalorder %s801_s0, %s572_s11  ;;  %p576_p9 = scmp.lt.u32.totalorder %s572_s11, %s801_s0 }
  0x18   :  { %p578_p10 = pnand %p576_p9, %p573_p8 }
  0x1a   :  { %581 = shalt.err (!%p578_p10)
}
  0x1b   :  { %s582_s16 = scalar_lea.vmem %s705_s21, 256  ;;  %p587_p12 = scmp.lt.s32.totalorder %s705_s21, %s705_s21 }
  0x1c   :  { %p583_p11 = scmp.ne.s32.totalorder %s705_s21, %s582_s16  ;;  %p588_p13 = scmp.lt.s32.totalorder %s582_s16, %s582_s16 }
  0x1e   :  { %p589_p0 = por %p588_p13, %p587_p12 }
  0x20   :  { %p590_p1 = pnand %p589_p0, %p583_p11 }
  0x22   :  { %593 = shalt.err (!%p590_p1)
}
  0x23   :  { %25 = dma.hbm_to_vmem [thread:$0]  %s801_s0, 256, %s705_s21, [#allocation5], %s670_s30, %s670_s30, %s671_s6  }
  0x24   :  { %s672_s18 = smov [#allocation9]   ;;  %s673_s20 = smov [#allocation10]  }
  0x25   :  { %s45_s19 = sshll.u32 %s672_s18, 4  ;;  %s57_s22 = sshll.u32 %s673_s20, 4  ;;  %s46_s19 = int_to_ptr.vmem [resolvable:$true] %s45_s19  ;;  %s742_s22 = int_to_ptr.vmem [resolvable:$true] %s57_s22 }
  0x26   :  { %s594_s25 = scalar_lea.hbm %s804_s3, 512 }
  0x27   :  { %p595_p2 = scmp.ne.s32.totalorder %s804_s3, %s594_s25  ;;  %p598_p3 = scmp.lt.u32.totalorder %s594_s25, %s804_s3 }
  0x29   :  { %p600_p4 = pnand %p598_p3, %p595_p2 }
  0x2b   :  { %603 = shalt.err (!%p600_p4)
}
  0x2c   :  { %s604_s0 = scalar_lea.vmem %s46_s19, 512  ;;  %p609_p6 = scmp.lt.s32.totalorder %s46_s19, %s46_s19 }
  0x2d   :  { %p605_p5 = scmp.ne.s32.totalorder %s46_s19, %s604_s0  ;;  %p610_p7 = scmp.lt.s32.totalorder %s604_s0, %s604_s0 }
  0x2f   :  { %p611_p8 = por %p610_p7, %p609_p6 }
  0x31   :  { %p612_p9 = pnand %p611_p8, %p605_p5 }
  0x33   :  { %615 = shalt.err (!%p612_p9)
}
  0x34   :  { %51 = dma.hbm_to_vmem [thread:$0]  %s804_s3, 512, %s46_s19, [#allocation8], %s670_s30, %s670_s30, %s671_s6  }
  0x35   :  { %s616_s10 = scalar_lea.hbm %s805_s4, 2048 }
  0x36   :  { %p617_p10 = scmp.ne.s32.totalorder %s805_s4, %s616_s10  ;;  %p620_p11 = scmp.lt.u32.totalorder %s616_s10, %s805_s4 }
  0x38   :  { %p622_p12 = pnand %p620_p11, %p617_p10 }
  0x3a   :  { %625 = shalt.err (!%p622_p12)
}
  0x3b   :  { %s626_s15 = scalar_lea.vmem %s742_s22, 2048  ;;  %p631_p0 = scmp.lt.s32.totalorder %s742_s22, %s742_s22 }
  0x3c   :  { %p627_p13 = scmp.ne.s32.totalorder %s742_s22, %s626_s15  ;;  %p632_p1 = scmp.lt.s32.totalorder %s626_s15, %s626_s15 }
  0x3e   :  { %p633_p2 = por %p632_p1, %p631_p0 }
  0x40   :  { %p634_p3 = pnand %p633_p2, %p627_p13 }
  0x42   :  { %637 = shalt.err (!%p634_p3)
}
  0x43   :  { %63 = dma.hbm_to_vmem [thread:$0]  %s805_s4, 2048, %s742_s22, [#allocation11], %s670_s30, %s670_s30, %s671_s6  }
  0x44   :  { %660 = dma.done.wait [#allocation5], 256  }
  0x45   :  { %661 = vsyncadd [#allocation5], 4294967040 }
  0x46   :  { %662 = dma.done.wait [#allocation8], 1024  }
  0x47   :  { %663 = vsyncadd [#allocation8], 4294966272 }
  0x48   :  { %664 = dma.done.wait [#allocation11], 2048  }
  0x49   :  { %665 = vsyncadd [#allocation11], 4294965248  ;;  %vm90_vm0 = vcmask 261120   ;;  %v86_v0 = vld [vmem:[#allocation7] sm:$0xff]  ;;  %v87_v1 = vld [vmem:[#allocation7 + $0x8] sm:$0xff]  ;;  %s674_s17 = smov [#allocation12]  }
  0x4a   :  { %v88_v2 = vld [vmem:[#allocation7 + $0x10] sm:$0xff]  ;;  %v493_v3 = vpack.c.bf16 %v87_v1, %v86_v0  ;;  %v89_v4 = vld [vmem:[#allocation7 + $0x18] sm:$0xff]  ;;  %v188_v7 = vld [vmem:[#allocation9] sm:$0xff]  ;;  %s387_s18 = sshll.u32 %s674_s17, 4  ;;  %s388_s18 = int_to_ptr.vmem [resolvable:$true] %s387_s18 }
  0x4b   :  { %v76_v5 = vld [vmem:[#allocation4] sm:$0xff]  ;;  %v497_v6 = vpack.c.bf16 %v89_v4, %v88_v2  ;;  %v189_v8 = vld [vmem:[#allocation9 + $0x8] sm:$0xff]  ;;  %v278_v9 = vld [vmem:[#allocation10] sm:$0xff]  ;;  %s638_s19 = scalar_lea.vmem %s388_s18, 256  ;;  %p643_p5 = scmp.lt.s32.totalorder %s388_s18, %s388_s18 }
  0x4c   :  { %444 = vmatprep.mubr.msk.f32.mxu1 %vm90_vm0, %v76_v5  ;;  %494 = vmatprep.subr.bf16.mxu1 %v493_v3  ;;  %v279_v10 = vld [vmem:[#allocation10 + $0x8] sm:$0xff]  ;;  %v280_v12 = vld [vmem:[#allocation10 + $0x10] sm:$0xff]  ;;  %v281_v13 = vld [vmem:[#allocation10 + $0x18] sm:$0xff]  ;;  %v501_v14 = vpack.c.bf16 %v189_v8, %v188_v7  ;;  %p639_p4 = scmp.ne.s32.totalorder %s388_s18, %s638_s19  ;;  %p644_p6 = scmp.lt.s32.totalorder %s638_s19, %s638_s19 }
  0x4d   :  { %496 = vmatpush3.bf16.msra.mxu1 %v493_v3  ;;  %v509_v11 = vpack.c.bf16 %v279_v10, %v278_v9  ;;  %v190_v15 = vld [vmem:[#allocation9 + $0x10] sm:$0xff]  ;;  %v513_v16 = vpack.c.bf16 %v281_v13, %v280_v12  ;;  %v191_v17 = vld [vmem:[#allocation9 + $0x18] sm:$0xff]  ;;  %v282_v18 = vld [vmem:[#allocation10 + $0x20] sm:$0xff] }
  0x4e   :  { %498 = vmatprep.subr.bf16.mxu1 %v497_v6  ;;  %v283_v19 = vld [vmem:[#allocation10 + $0x28] sm:$0xff]  ;;  %v77_v20 = vld [vmem:[#allocation4 + $0x8] sm:$0xff]  ;;  %v505_v21 = vpack.c.bf16 %v191_v17, %v190_v15  ;;  %v284_v23 = vld [vmem:[#allocation10 + $0x30] sm:$0xff]  ;;  %p645_p7 = por %p644_p6, %p643_p5 }
  0x4f   :  { %510 = vmatprep.subr.bf16.mxu0 %v509_v11  ;;  %v517_v22 = vpack.c.bf16 %v283_v19, %v282_v18  ;;  %v285_v24 = vld [vmem:[#allocation10 + $0x38] sm:$0xff]  ;;  %v286_v26 = vld [vmem:[#allocation10 + $0x40] sm:$0xff]  ;;  %v287_v27 = vld [vmem:[#allocation10 + $0x48] sm:$0xff] }
  0x50   :  { %512 = vmatpush3.bf16.msra.mxu0 %v509_v11  ;;  %v521_v25 = vpack.c.bf16 %v285_v24, %v284_v23  ;;  %v525_v28 = vpack.c.bf16 %v287_v27, %v286_v26  ;;  %v288_v29 = vld [vmem:[#allocation10 + $0x50] sm:$0xff]  ;;  %v289_v30 = vld [vmem:[#allocation10 + $0x58] sm:$0xff]  ;;  %v290_v32 = vld [vmem:[#allocation10 + $0x60] sm:$0xff]  ;;  %p646_p8 = pnand %p645_p7, %p639_p4 }
  0x51   :  { %500 = vmatpush3.bf16.msra.mxu1 %v497_v6  ;;  %514 = vmatprep.subr.bf16.mxu0 %v513_v16  ;;  %v529_v31 = vpack.c.bf16 %v289_v30, %v288_v29  ;;  %v291_v33 = vld [vmem:[#allocation10 + $0x68] sm:$0xff]  ;;  %v292_v35 = vld [vmem:[#allocation10 + $0x70] sm:$0xff]  ;;  %v293_v36 = vld [vmem:[#allocation10 + $0x78] sm:$0xff] }
  0x52   :  { %502 = vmatprep.subr.bf16.mxu1 %v501_v14  ;;  %v533_v34 = vpack.c.bf16 %v291_v33, %v290_v32  ;;  %v537_v37 = vpack.c.bf16 %v293_v36, %v292_v35  ;;  %v405_v43 = vld [vmem:[%s803_s2] ss:$0 sm:$0xff] }
  0x54   :  { %445 = vmatmul.mubr.msk.f32.vlgmr.msra.gmra.mrb[0].mxu1 %vm90_vm0, %v77_v20  ;;  %516 = vmatpush3.bf16.msra.mxu0 %v513_v16 }
  0x55   :  { %504 = vmatpush3.bf16.msra.mxu1 %v501_v14  ;;  %455 = vmatprep.mubr.msk.f32.mxu1 %vm90_vm0, %v76_v5 }
  0x56   :  { %506 = vmatprep.subr.bf16.mxu1 %v505_v21  ;;  %518 = vmatprep.subr.bf16.mxu0 %v517_v22 }
  0x58   :  { %520 = vmatpush3.bf16.msra.mxu0 %v517_v22 }
  0x59   :  { %508 = vmatpush3.bf16.msra.mxu1 %v505_v21  ;;  %522 = vmatprep.subr.bf16.mxu0 %v521_v25 }
  0x5c   :  { %456 = vmatmul.mubr.msk.f32.vlgmr.msra.gmra.mrb[2].mxu1 %vm90_vm0, %v77_v20  ;;  %524 = vmatpush3.bf16.msra.mxu0 %v521_v25 }
  0x5d   :  { %526 = vmatprep.subr.bf16.mxu0 %v525_v28 }
  0x60   :  { %528 = vmatpush3.bf16.msra.mxu0 %v525_v28 }
  0x61   :  { %530 = vmatprep.subr.bf16.mxu0 %v529_v31 }
  0x64   :  { %532 = vmatpush3.bf16.msra.mxu0 %v529_v31 }
  0x65   :  { %534 = vmatprep.subr.bf16.mxu0 %v533_v34 }
  0x68   :  { %536 = vmatpush3.bf16.msra.mxu0 %v533_v34 }
  0x69   :  { %538 = vmatprep.subr.bf16.mxu0 %v537_v37 }
  0x6c   :  { %540 = vmatpush3.bf16.msra.mxu0 %v537_v37 }
 0x127   :  { %v446_v38 = vpop.f32.mrb[0].mxu1 }
 0x128   :  { %v163_v39 = vpop.f32.mrb[1].mxu1 }
 0x12f   :  { %v457_v40 = vpop.f32.mrb[2].mxu1 }
 0x130   :  { %v258_v41 = vpop.f32.mrb[3].mxu1 }
 0x131   :  { %490 = vmatprep.mubr.f32.mxu0 %v258_v41 }
 0x132   :  { %491 = vmatmul.mubr.f32.vlgmr.msra.gmra.mrb[0].mxu0 %v457_v40 }
 0x205   :  { %v492_v42 = vpop.f32.mrb[0].mxu0 }
 0x206   :  { %v370_v44 = vadd.f32 %v492_v42, %v446_v38  ;;  %v360_v45 = vpop.f32.mrb[1].mxu0 }
 0x207   :  { %v369_v46 = vadd.f32 %v360_v45, %v163_v39 }
 0x208   :  { %v379_v47 = vadd.f32 %v405_v43, %v370_v44 }
 0x209   :  { %v378_v48 = vadd.f32 %v405_v43, %v369_v46 }
 0x20a   :  { %381 = vst [vmem:[#allocation12 + $0x8] sm:$0xff] %v379_v47 }
 0x20b   :  { %380 = vst [vmem:[#allocation12] sm:$0xff] %v378_v48 }
 0x20c   :  { %649 = shalt.err (!%p646_p8)
}
 0x20d   :  { %s650_s2 = scalar_lea.hbm %s806_s5, 256 }
 0x20e   :  { %p651_p9 = scmp.ne.s32.totalorder %s806_s5, %s650_s2  ;;  %p654_p10 = scmp.lt.u32.totalorder %s650_s2, %s806_s5 }
 0x210   :  { %p656_p11 = pnand %p654_p10, %p651_p9 }
 0x212   :  { %659 = shalt.err (!%p656_p11)
}
 0x213   :  { %393 = dma.vmem_to_hbm [thread:$0]  %s388_s18, 256, %s806_s5, [#allocation6], %s670_s30, %s670_s30, %s671_s6  }
 0x214   :  { %666 = dma.done.wait [#allocation6], 256  }
 0x215   :  { %667 = vsyncadd [#allocation6], 4294967040 }
 0x216   :  { %397 = vsyncpa [#allocation5], 1 }
 0x217   :  { %398 = vsyncpa [#allocation8], 1 }
 0x218   :  { %399 = vsyncpa [#allocation11], 1 }
 0x219   :  { %400 = vsyncpa [#allocation6], 1 }

</bundles_post_ra>
